<compile_context>
chip_gen: v5e
topology: v5e:2x2
jax: 0.10.0
libtpu: 0.0.40
codegen_flags: <defaults>
</compile_context>

<pallas_src>
import functools
from typing import NamedTuple

import jax
import jax.numpy as jnp
from jax.experimental import pallas as pl
from jax.experimental.pallas import tpu as pltpu


# ---------------------------------------------------------------------------
# Kernels
# ---------------------------------------------------------------------------
def _ffn_kernel_single(x_ref, w1_ref, b1_ref, w2_ref, b2_ref, o_ref):
    # Whole hidden dim in one tile: no accumulator scratch needed.
    h = jnp.dot(x_ref[...], w1_ref[...], preferred_element_type=jnp.float32)
    h = jnp.maximum(h + b1_ref[...], 0.0)
    o_ref[...] = (jnp.dot(h.astype(w2_ref.dtype), w2_ref[...],
                          preferred_element_type=jnp.float32)
                  + b2_ref[...]).astype(o_ref.dtype)


def _ffn_kernel_acc(x_ref, w1_ref, b1_ref, w2_ref, b2_ref, o_ref, acc_ref):
    # Hidden dim tiled (reduction axis = last grid axis); f32 accumulator
    # resident across it.
    h_idx = pl.program_id(1)

    @pl.when(h_idx == 0)
    def _():
        acc_ref[...] = jnp.zeros_like(acc_ref)

    h = jnp.dot(x_ref[...], w1_ref[...],
                preferred_element_type=jnp.float32) + b1_ref[...]
    h = jnp.maximum(h, 0.0)
    acc_ref[...] += jnp.dot(h.astype(w2_ref.dtype), w2_ref[...],
                            preferred_element_type=jnp.float32)

    @pl.when(h_idx == pl.num_programs(1) - 1)
    def _():
        o_ref[...] = (acc_ref[...] + b2_ref[...]).astype(o_ref.dtype)


# ---------------------------------------------------------------------------
# Chip / tiling helpers (Python-time, static under jit)
# ---------------------------------------------------------------------------
def _cdiv(a, b):
    return -(-a // b)


def _round_up(n, m):
    return _cdiv(n, m) * m


def _detect_chip():
    """(align, vmem_limit_bytes, num_cores_per_chip, is_v5e)."""
    kind = ""
    try:
        kind = jax.devices()[0].device_kind.lower()
    except Exception:
        pass
    is_v7 = "v7" in kind
    is_v6 = "v6" in kind
    is_v5e = ("v5e" in kind) or ("v5 lite" in kind) or ("v5litepod" in kind)
    # 256x256 MXU on v6e/v7x -> 256 alignment; 128x128 on v5e and older.
    align = 256 if (is_v6 or is_v7) else 128
    try:
        vmem_cap = int(pltpu.get_tpu_info().vmem_capacity_bytes)
    except Exception:
        vmem_cap = (64 if is_v7 else 128) * 1024 * 1024
    # Leave headroom for Mosaic internal scratch: ~3/4 of physical, capped.
    vmem_limit = min((vmem_cap * 3) // 4, 100 * 1024 * 1024)
    num_cores = 2 if is_v7 else 1
    return align, vmem_limit, num_cores, is_v5e


def _sublane(dtype):
    return max(8, 32 // jnp.dtype(dtype).itemsize)


def _pick_tm(m, d_pad, tk_h, isz, wsz, acc_needed, sublane, vmem_limit,
             num_cores, tm_max=1024):
    """Row tile: as big as the VMEM budget allows, minimal row-pad waste,
    and >=1 block per TensorCore on dual-core chips."""
    m_ceil = _round_up(max(m, 1), sublane)
    # Per-grid-step VMEM: double-buffered weight blocks + double-buffered
    # x/out blocks (+ f32 accumulator when the hidden dim is tiled).
    weight_bytes = 2 * 2 * d_pad * tk_h * wsz + 2 * (tk_h + d_pad) * wsz
    per_row_bytes = d_pad * (4 * isz + (4 if acc_needed else 0))
    budget = (vmem_limit * 9) // 10 - weight_bytes
    tm_cap = sublane
    if budget > 0:
        tm_cap = max(sublane,
                     min(tm_max, (budget // per_row_bytes) // sublane * sublane))
    tm_cap = min(tm_cap, m_ceil)
    # Minimise row-pad waste; make sure both TensorCores get work on v7x.
    n_blocks = _cdiv(m, tm_cap)
    if num_cores > 1 and n_blocks < num_cores and m_ceil >= num_cores * sublane:
        n_blocks = num_cores
    tm = min(tm_cap, _round_up(_cdiv(m, n_blocks), sublane))
    return max(tm, sublane)


# ---------------------------------------------------------------------------
# Parameter preparation (padding hoisted out of the forward path)
# ---------------------------------------------------------------------------
class FFNConfig(NamedTuple):
    d_out: int
    n_hidden: int
    d_pad: int
    h_pad: int
    tk_h: int
    vmem_limit: int
    num_cores: int
    deep_weight_prefetch: bool = False


def prepare_ffn_params(w1, b1, w2, b2, *, tk_h_max=512, deep_weight_prefetch=False):
    """Pad parameters ONCE to MXU/lane-aligned shapes; returns (params, cfg).

    Zero padding is exact: padded input cols hit zero weight rows, padded
    hidden units contribute 0 through zero w2 rows, padded output cols are
    sliced off in the forward.
    """
    d_out, n_hidden = w1.shape
    align, vmem_limit, num_cores, is_v5e = _detect_chip()
    wsz = jnp.dtype(w1.dtype).itemsize

    d_pad = _round_up(d_out, align)

    # Hidden tile: keep double-buffered W1+W2 blocks within ~40% of the VMEM
    # budget, rounded to MXU alignment, capped at tk_h_max.
    tk_budget = (vmem_limit * 2 // 5) // (4 * d_pad * wsz)
    tk_h_cap = max(align, min(tk_h_max, (tk_budget // align) * align))
    n_h = max(1, _cdiv(n_hidden, tk_h_cap))
    tk_h = _round_up(_cdiv(n_hidden, n_h), align)
    h_pad = n_h * tk_h

    b1 = jnp.asarray(b1).reshape(1, -1)
    b2 = jnp.asarray(b2).reshape(1, -1)
    w1_p = jnp.pad(w1, ((0, d_pad - d_out), (0, h_pad - n_hidden)))
    b1_p = jnp.pad(b1, ((0, 0), (0, h_pad - n_hidden)))
    w2_p = jnp.pad(w2, ((0, h_pad - n_hidden), (0, d_pad - d_out)))
    b2_p = jnp.pad(b2, ((0, 0), (0, d_pad - d_out)))

    cfg = FFNConfig(d_out=d_out, n_hidden=n_hidden, d_pad=d_pad, h_pad=h_pad,
                    tk_h=tk_h, vmem_limit=int(vmem_limit), num_cores=num_cores,
                    deep_weight_prefetch=bool(deep_weight_prefetch and is_v5e))
    return (w1_p, b1_p, w2_p, b2_p), cfg


# ---------------------------------------------------------------------------
# Forward
# ---------------------------------------------------------------------------
@functools.partial(jax.jit, static_argnames=("cfg",))
def feed_forward_net(x, params, *, cfg):
    """x: (..., d_out) -> (..., d_out). Fused Linear->ReLU->Linear on TPU."""
    w1_p, b1_p, w2_p, b2_p = params
    orig_shape = x.shape
    d_out, d_pad, h_pad, tk_h = cfg.d_out, cfg.d_pad, cfg.h_pad, cfg.tk_h
    x2 = x.reshape(-1, d_out)
    m = x2.shape[0]

    dt = x.dtype
    isz = jnp.dtype(dt).itemsize
    wsz = jnp.dtype(w1_p.dtype).itemsize
    sublane = _sublane(dt)

    n_h = h_pad // tk_h
    acc_needed = n_h > 1

    tm = _pick_tm(m, d_pad, tk_h, isz, wsz, acc_needed, sublane,
                  cfg.vmem_limit, cfg.num_cores)
    m_pad = _round_up(m, tm)
    grid0 = m_pad // tm

    # Statically skip activation padding when already aligned.
    if m_pad != m or d_pad != d_out:
        x_p = jnp.pad(x2, ((0, m_pad - m), (0, d_pad - d_out)))
    else:
        x_p = x2

    # Truthful cost: weights are re-fetched once per row tile when the hidden
    # axis is tiled (their index_maps reset when i changes).
    weight_passes = grid0 if acc_needed else 1
    cost = pl.CostEstimate(
        flops=4 * m_pad * d_pad * h_pad,               # two matmuls, 2 flops/MAC
        transcendentals=0,
        bytes_accessed=(2 * isz * m_pad * d_pad         # x in, y out
                        + weight_passes * wsz * (2 * d_pad * h_pad + h_pad + d_pad)),
    )
    cparams = pltpu.CompilerParams(
        dimension_semantics=("parallel", "arbitrary") if acc_needed else ("parallel",),
        vmem_limit_bytes=cfg.vmem_limit,
    )
    out_shape = jax.ShapeDtypeStruct((m_pad, d_pad), dt)

    if not acc_needed:
        # Whole hidden dim fits one tile: weights are fetched once (index_maps
        # constant over i), no accumulator scratch, single-pass kernel.
        out = pl.pallas_call(
            _ffn_kernel_single,
            out_shape=out_shape,
            grid_spec=pltpu.PrefetchScalarGridSpec(
                num_scalar_prefetch=0,
                grid=(grid0,),
                in_specs=[
                    pl.BlockSpec((tm, d_pad), lambda i: (i, 0)),      # x rows
                    pl.BlockSpec((d_pad, tk_h), lambda i: (0, 0)),    # W1^T
                    pl.BlockSpec((1, tk_h), lambda i: (0, 0)),        # b1
                    pl.BlockSpec((tk_h, d_pad), lambda i: (0, 0)),    # W2^T
                    pl.BlockSpec((1, d_pad), lambda i: (0, 0)),       # b2
                ],
                out_specs=pl.BlockSpec((tm, d_pad), lambda i: (i, 0)),
            ),
            compiler_params=cparams,
            cost_estimate=cost,
        )(x_p, w1_p, b1_p, w2_p, b2_p)
    else:
        # Deeper weight prefetch for bandwidth-starved v5e (opt-in).
        def _w_spec(shape, idx_map):
            if cfg.deep_weight_prefetch and n_h >= 3:
                return pl.BlockSpec(shape, idx_map, pipeline_mode=pl.Buffered(3))
            return pl.BlockSpec(shape, idx_map)

        out = pl.pallas_call(
            _ffn_kernel_acc,
            out_shape=out_shape,
            grid_spec=pltpu.PrefetchScalarGridSpec(
                num_scalar_prefetch=0,
                grid=(grid0, n_h),
                in_specs=[
                    pl.BlockSpec((tm, d_pad), lambda i, h: (i, 0)),   # x rows
                    _w_spec((d_pad, tk_h), lambda i, h: (0, h)),      # W1^T slice
                    pl.BlockSpec((1, tk_h), lambda i, h: (0, h)),     # b1 slice
                    _w_spec((tk_h, d_pad), lambda i, h: (h, 0)),      # W2^T slice
                    pl.BlockSpec((1, d_pad), lambda i, h: (0, 0)),    # b2
                ],
                out_specs=pl.BlockSpec((tm, d_pad), lambda i, h: (i, 0)),
                scratch_shapes=[pltpu.VMEM((tm, d_pad), jnp.float32)],
            ),
            compiler_params=cparams,
            cost_estimate=cost,
        )(x_p, w1_p, b1_p, w2_p, b2_p)

    # Statically skip the slice in the already-aligned case.
    if m_pad != m or d_pad != d_out:
        out = out[:m, :d_out]
    return out.reshape(orig_shape)


# ---------------------------------------------------------------------------
# Param init (torch.nn.Linear-style) and pure-JAX reference
# ---------------------------------------------------------------------------
def init_params(key, d_out, n_hidden, dtype=jnp.float32):
    """U(-1/sqrt(fan_in), 1/sqrt(fan_in)); weights stored transposed:
    w1 (d_out, n_hidden), w2 (n_hidden, d_out)."""
    k1, k2, k3, k4 = jax.random.split(key, 4)
    lim1 = 1.0 / jnp.sqrt(d_out)
    lim2 = 1.0 / jnp.sqrt(n_hidden)
    w1 = jax.random.uniform(k1, (d_out, n_hidden), dtype, -lim1, lim1)
    b1 = jax.random.uniform(k2, (1, n_hidden), dtype, -lim1, lim1)
    w2 = jax.random.uniform(k3, (n_hidden, d_out), dtype, -lim2, lim2)
    b2 = jax.random.uniform(k4, (1, d_out), dtype, -lim2, lim2)
    return w1, b1, w2, b2


def _reference(x, w1, b1, w2, b2):
    return jnp.maximum(x @ w1 + b1[0], 0.0) @ w2 + b2[0]


if __name__ == "__main__":
    key = jax.random.PRNGKey(0)

    # --- Test 1: module-typical small shapes (batch=2, seq=8, d_out=32, hid=64),
    # exercises the scratch-free single-hidden-tile kernel.
    batch, seq, d_out, n_hidden = 2, 8, 32, 64
    kx, kp, key = jax.random.split(key, 3)
    x = jax.random.normal(kx, (batch, seq, d_out), dtype=jnp.float32)
    raw = init_params(kp, d_out, n_hidden)
    params, cfg = prepare_ffn_params(*raw)
    y = jax.block_until_ready(feed_forward_net(x, params, cfg=cfg))
    ref = _reference(x, *raw)
    assert y.shape == x.shape
    assert jnp.allclose(y, ref, atol=2e-5, rtol=1e-5), "test1 mismatch"

    # --- Test 2: exercises row padding (m=300), feature padding (d_out=96),
    # and hidden-axis accumulation (n_hidden=1100 -> multiple hidden tiles).
    kx2, kp2 = jax.random.split(key)
    d_out2, n_hidden2 = 96, 1100
    x2 = jax.random.normal(kx2, (300, d_out2), dtype=jnp.float32)
    raw2 = init_params(kp2, d_out2, n_hidden2)
    params2, cfg2 = prepare_ffn_params(*raw2)
    y2 = jax.block_until_ready(feed_forward_net(x2, params2, cfg=cfg2))
    ref2 = _reference(x2, *raw2)
    assert y2.shape == x2.shape
    assert jnp.allclose(y2, ref2, atol=1e-4, rtol=1e-5), "test2 mismatch"

    print("KERNEL_OK")
</pallas_src>

<mosaic_0001>
module attributes {stable_mosaic.version = 11 : i64} {
  func.func @_ffn_kernel_single(%arg0: i32, %arg1: memref<16x128xf32, #tpu.memory_space<vmem>>, %arg2: memref<128x128xf32, #tpu.memory_space<vmem>>, %arg3: memref<1x128xf32, #tpu.memory_space<vmem>>, %arg4: memref<128x128xf32, #tpu.memory_space<vmem>>, %arg5: memref<1x128xf32, #tpu.memory_space<vmem>>, %arg6: memref<16x128xf32, #tpu.memory_space<vmem>>) attributes {dimension_semantics = [#tpu.dimension_semantics<parallel>], iteration_bounds = array<i64: 1>, scalar_prefetch = 0 : i64, scratch_operands = 0 : i64, tpu.core_type = #tpu.core_type<tc>, window_params = [{transform_indices = @transform_0, window_bounds = array<i64: 16, 128>}, {pipeline_mode = #tpu.pipeline_mode<synchronous>, transform_indices = @transform_1, window_bounds = array<i64: 128, 128>}, {pipeline_mode = #tpu.pipeline_mode<synchronous>, transform_indices = @transform_2, window_bounds = array<i64: 1, 128>}, {pipeline_mode = #tpu.pipeline_mode<synchronous>, transform_indices = @transform_3, window_bounds = array<i64: 128, 128>}, {pipeline_mode = #tpu.pipeline_mode<synchronous>, transform_indices = @transform_4, window_bounds = array<i64: 1, 128>}, {transform_indices = @transform_5, window_bounds = array<i64: 16, 128>}]} {
    %c0 = arith.constant 0 : index
    %c0_0 = arith.constant 0 : index
    %0 = vector.load %arg1[%c0, %c0_0] : memref<16x128xf32, #tpu.memory_space<vmem>>, vector<16x128xf32>
    %c0_1 = arith.constant 0 : index
    %c0_2 = arith.constant 0 : index
    %1 = vector.load %arg2[%c0_1, %c0_2] : memref<128x128xf32, #tpu.memory_space<vmem>>, vector<128x128xf32>
    %cst = arith.constant dense<0.000000e+00> : vector<16x128xf32>
    %2 = tpu.matmul %0, %1, %cst {dimension_numbers = #tpu.dot_dimension_numbers<[1], [0], [0], [1], [0, 0, 1, 1], [], []>} : vector<16x128xf32>, vector<128x128xf32>, vector<16x128xf32> -> vector<16x128xf32>
    %c0_3 = arith.constant 0 : index
    %c0_4 = arith.constant 0 : index
    %3 = vector.load %arg3[%c0_3, %c0_4] : memref<1x128xf32, #tpu.memory_space<vmem>>, vector<1x128xf32>
    %4 = vector.broadcast %3 : vector<1x128xf32> to vector<16x128xf32>
    %5 = arith.addf %2, %4 : vector<16x128xf32>
    %cst_5 = arith.constant 0.000000e+00 : f32
    %6 = vector.broadcast %cst_5 : f32 to vector<16x128xf32>
    %7 = arith.maximumf %5, %6 : vector<16x128xf32>
    %c0_6 = arith.constant 0 : index
    %c0_7 = arith.constant 0 : index
    %8 = vector.load %arg4[%c0_6, %c0_7] : memref<128x128xf32, #tpu.memory_space<vmem>>, vector<128x128xf32>
    %cst_8 = arith.constant dense<0.000000e+00> : vector<16x128xf32>
    %9 = tpu.matmul %7, %8, %cst_8 {dimension_numbers = #tpu.dot_dimension_numbers<[1], [0], [0], [1], [0, 0, 1, 1], [], []>} : vector<16x128xf32>, vector<128x128xf32>, vector<16x128xf32> -> vector<16x128xf32>
    %c0_9 = arith.constant 0 : index
    %c0_10 = arith.constant 0 : index
    %10 = vector.load %arg5[%c0_9, %c0_10] : memref<1x128xf32, #tpu.memory_space<vmem>>, vector<1x128xf32>
    %11 = vector.broadcast %10 : vector<1x128xf32> to vector<16x128xf32>
    %12 = arith.addf %9, %11 : vector<16x128xf32>
    %c0_11 = arith.constant 0 : index
    %c0_12 = arith.constant 0 : index
    %13 = vector.load %arg6[%c0_11, %c0_12] : memref<16x128xf32, #tpu.memory_space<vmem>>, vector<16x128xf32>
    tpu.vector_store %arg6[%c0_11, %c0_12], %12 {strides = array<i32>} : memref<16x128xf32, #tpu.memory_space<vmem>>, vector<16x128xf32>,
    return
  }
  func.func @transform_0(%arg0: i32) -> (i32, i32) {
    %c0_i32 = arith.constant 0 : i32
    %c0_i32_0 = arith.constant 0 : i32
    return %arg0, %c0_i32 : i32, i32
  }
  func.func @transform_1(%arg0: i32) -> (i32, i32) {
    %c0_i32 = arith.constant 0 : i32
    %c0_i32_0 = arith.constant 0 : i32
    %c0_i32_1 = arith.constant 0 : i32
    return %c0_i32, %c0_i32_0 : i32, i32
  }
  func.func @transform_2(%arg0: i32) -> (i32, i32) {
    %c0_i32 = arith.constant 0 : i32
    %c0_i32_0 = arith.constant 0 : i32
    %c0_i32_1 = arith.constant 0 : i32
    return %c0_i32, %c0_i32_0 : i32, i32
  }
  func.func @transform_3(%arg0: i32) -> (i32, i32) {
    %c0_i32 = arith.constant 0 : i32
    %c0_i32_0 = arith.constant 0 : i32
    %c0_i32_1 = arith.constant 0 : i32
    return %c0_i32, %c0_i32_0 : i32, i32
  }
  func.func @transform_4(%arg0: i32) -> (i32, i32) {
    %c0_i32 = arith.constant 0 : i32
    %c0_i32_0 = arith.constant 0 : i32
    %c0_i32_1 = arith.constant 0 : i32
    return %c0_i32, %c0_i32_0 : i32, i32
  }
  func.func @transform_5(%arg0: i32) -> (i32, i32) {
    %c0_i32 = arith.constant 0 : i32
    %c0_i32_0 = arith.constant 0 : i32
    return %arg0, %c0_i32 : i32, i32
  }
}

</mosaic_0001>

<bundles_post_ra>
// kernel: feed_forward_net.1
= control target key start
LH: loop header
LB: loop body
LE: loop exit
PB: predicated region body
PF: predicated region fallthrough
CT: control target
= control target key end

     0   :  { %10 = vsyncpa [#allocation3], 0  ;;  %s298_s0 = inlined_call_operand.vmem [shape: f32[16,128], index: 0, kind: input, shape index: {}]   ;;  %s299_s1 = inlined_call_operand.hbm [shape: f32[128,128], index: 1, kind: input, shape index: {}]   ;;  %s300_s2 = inlined_call_operand.vmem [shape: f32[1,128], index: 2, kind: input, shape index: {}]   ;;  %s301_s3 = inlined_call_operand.hbm [shape: f32[128,128], index: 3, kind: input, shape index: {}]   ;;  %s302_s4 = inlined_call_operand.vmem [shape: f32[1,128], index: 4, kind: input, shape index: {}]   ;;  %s303_s5 = inlined_call_operand.vmem [shape: f32[16,128], index: 5, kind: output, shape index: {}]  }
   0x1   :  { %s18_s20 = sshll.u32 %s299_s1, 4  ;;  %s19_s20 = int_to_ptr.hbm [resolvable:$true] %s18_s20 }
   0x2   :  { %11 = vsyncpa [#allocation5], 0  ;;  %s240_s21 = smov [#allocation2]   ;;  %s33_s25 = sshll.u32 %s301_s3, 4  ;;  %s34_s25 = int_to_ptr.hbm [resolvable:$true] %s33_s25 }
   0x3   :  { %s20_s22 = sshll.u32 %s240_s21, 4  ;;  %s241_s26 = smov 128   ;;  %s21_s22 = int_to_ptr.vmem [resolvable:$true] %s20_s22 }
   0x4   :  { %s242_s27 = smov 8   ;;  %s243_s28 = smov [#allocation4]  }
   0x5   :  { %26 = dma.hbm_to_vmem [thread:$0]  %s19_s20, 2048, %s21_s22, [#allocation3], %s241_s26, %s241_s26, %s242_s27  }
   0x6   :  { %s35_s29 = sshll.u32 %s243_s28, 4  ;;  %s36_s29 = int_to_ptr.vmem [resolvable:$true] %s35_s29 }
   0x7   :  { %41 = dma.hbm_to_vmem [thread:$0]  %s34_s25, 2048, %s36_s29, [#allocation5], %s241_s26, %s241_s26, %s242_s27  }
   0x8   :  { %236 = dma.done.wait [#allocation3], 2048  }
   0x9   :  { %237 = vsyncadd [#allocation3], 4294965248 }
   0xa   :  { %238 = dma.done.wait [#allocation5], 2048  }
   0xb   :  { %239 = vsyncadd [#allocation5], 4294965248  ;;  %v69_v0 = vld [vmem:[#allocation2 + $0x78] sm:$0xff]  ;;  %v68_v1 = vld [vmem:[#allocation2 + $0x70] sm:$0xff] }
   0xc   :  { %150 = vmatpush.msra.mxu2 %v69_v0  ;;  %74 = vmatpush.msra.mxu0 %v69_v0  ;;  %v67_v2 = vld [vmem:[#allocation2 + $0x68] sm:$0xff]  ;;  %v66_v3 = vld [vmem:[#allocation2 + $0x60] sm:$0xff]  ;;  %v65_v4 = vld [vmem:[#allocation2 + $0x58] sm:$0xff] }
   0xd   :  { %v114_v5 = vld [vmem:[#allocation4 + $0x78] sm:$0xff]  ;;  %v113_v6 = vld [vmem:[#allocation4 + $0x70] sm:$0xff]  ;;  %v112_v8 = vld [vmem:[#allocation4 + $0x68] sm:$0xff] }
   0xe   :  { %151 = vmatpush.msra.mxu2 %v68_v1  ;;  %75 = vmatpush.msra.mxu0 %v68_v1  ;;  %v64_v7 = vld [vmem:[#allocation2 + $0x50] sm:$0xff]  ;;  %v63_v9 = vld [vmem:[#allocation2 + $0x48] sm:$0xff]  ;;  %v111_v10 = vld [vmem:[#allocation4 + $0x60] sm:$0xff] }
   0xf   :  { %166 = vmatpush.msra.mxu3 %v114_v5  ;;  %119 = vmatpush.msra.mxu1 %v114_v5  ;;  %v62_v11 = vld [vmem:[#allocation2 + $0x40] sm:$0xff]  ;;  %v110_v12 = vld [vmem:[#allocation4 + $0x58] sm:$0xff]  ;;  %v109_v14 = vld [vmem:[#allocation4 + $0x50] sm:$0xff] }
  0x10   :  { %152 = vmatpush.msra.mxu2 %v67_v2  ;;  %76 = vmatpush.msra.mxu0 %v67_v2  ;;  %v61_v13 = vld [vmem:[#allocation2 + $0x38] sm:$0xff]  ;;  %v60_v15 = vld [vmem:[#allocation2 + $0x30] sm:$0xff]  ;;  %v108_v16 = vld [vmem:[#allocation4 + $0x48] sm:$0xff] }
  0x11   :  { %167 = vmatpush.msra.mxu3 %v113_v6  ;;  %120 = vmatpush.msra.mxu1 %v113_v6  ;;  %v59_v17 = vld [vmem:[#allocation2 + $0x28] sm:$0xff]  ;;  %v107_v18 = vld [vmem:[#allocation4 + $0x40] sm:$0xff]  ;;  %v106_v20 = vld [vmem:[#allocation4 + $0x38] sm:$0xff] }
  0x12   :  { %153 = vmatpush.msra.mxu2 %v66_v3  ;;  %77 = vmatpush.msra.mxu0 %v66_v3  ;;  %v58_v19 = vld [vmem:[#allocation2 + $0x20] sm:$0xff]  ;;  %v57_v21 = vld [vmem:[#allocation2 + $0x18] sm:$0xff]  ;;  %v105_v22 = vld [vmem:[#allocation4 + $0x30] sm:$0xff] }
  0x13   :  { %168 = vmatpush.msra.mxu3 %v112_v8  ;;  %121 = vmatpush.msra.mxu1 %v112_v8  ;;  %v56_v23 = vld [vmem:[#allocation2 + $0x10] sm:$0xff]  ;;  %v104_v24 = vld [vmem:[#allocation4 + $0x28] sm:$0xff]  ;;  %v103_v26 = vld [vmem:[#allocation4 + $0x20] sm:$0xff] }
  0x14   :  { %154 = vmatpush.msra.mxu2 %v65_v4  ;;  %78 = vmatpush.msra.mxu0 %v65_v4  ;;  %v55_v25 = vld [vmem:[#allocation2 + $0x8] sm:$0xff]  ;;  %v54_v27 = vld [vmem:[#allocation2] sm:$0xff]  ;;  %v102_v30 = vld [vmem:[#allocation4 + $0x18] sm:$0xff] }
  0x15   :  { %169 = vmatpush.msra.mxu3 %v111_v10  ;;  %122 = vmatpush.msra.mxu1 %v111_v10  ;;  %v53_v28 = vld [vmem:[%s298_s0 + $0x8] sm:$0xff]  ;;  %v52_v29 = vld [vmem:[%s298_s0] sm:$0xff]  ;;  %v101_v31 = vld [vmem:[#allocation4 + $0x10] sm:$0xff] }
  0x16   :  { %155 = vmatpush.msra.mxu2 %v64_v7  ;;  %79 = vmatpush.msra.mxu0 %v64_v7  ;;  %v100_v32 = vld [vmem:[#allocation4 + $0x8] sm:$0xff]  ;;  %v99_v33 = vld [vmem:[#allocation4] sm:$0xff] }
  0x17   :  { %170 = vmatpush.msra.mxu3 %v110_v12  ;;  %123 = vmatpush.msra.mxu1 %v110_v12  ;;  %v186_v34 = vld [vmem:[%s300_s2] ss:$0 sm:$0xff] }
  0x18   :  { %156 = vmatpush.msra.mxu2 %v63_v9  ;;  %80 = vmatpush.msra.mxu0 %v63_v9  ;;  %v187_v41 = vld [vmem:[%s302_s4] ss:$0 sm:$0xff] }
  0x19   :  { %171 = vmatpush.msra.mxu3 %v109_v14  ;;  %124 = vmatpush.msra.mxu1 %v109_v14 }
  0x1a   :  { %157 = vmatpush.msra.mxu2 %v62_v11  ;;  %81 = vmatpush.msra.mxu0 %v62_v11 }
  0x1b   :  { %172 = vmatpush.msra.mxu3 %v108_v16  ;;  %125 = vmatpush.msra.mxu1 %v108_v16 }
  0x1c   :  { %158 = vmatpush.msra.mxu2 %v61_v13  ;;  %82 = vmatpush.msra.mxu0 %v61_v13 }
  0x1d   :  { %173 = vmatpush.msra.mxu3 %v107_v18  ;;  %126 = vmatpush.msra.mxu1 %v107_v18 }
  0x1e   :  { %159 = vmatpush.msra.mxu2 %v60_v15  ;;  %83 = vmatpush.msra.mxu0 %v60_v15 }
  0x1f   :  { %174 = vmatpush.msra.mxu3 %v106_v20  ;;  %127 = vmatpush.msra.mxu1 %v106_v20 }
  0x20   :  { %160 = vmatpush.msra.mxu2 %v59_v17  ;;  %84 = vmatpush.msra.mxu0 %v59_v17 }
  0x21   :  { %175 = vmatpush.msra.mxu3 %v105_v22  ;;  %128 = vmatpush.msra.mxu1 %v105_v22 }
  0x22   :  { %161 = vmatpush.msra.mxu2 %v58_v19  ;;  %85 = vmatpush.msra.mxu0 %v58_v19 }
  0x23   :  { %176 = vmatpush.msra.mxu3 %v104_v24  ;;  %129 = vmatpush.msra.mxu1 %v104_v24 }
  0x24   :  { %162 = vmatpush.msra.mxu2 %v57_v21  ;;  %86 = vmatpush.msra.mxu0 %v57_v21 }
  0x25   :  { %177 = vmatpush.msra.mxu3 %v103_v26  ;;  %130 = vmatpush.msra.mxu1 %v103_v26 }
  0x26   :  { %163 = vmatpush.msra.mxu2 %v56_v23  ;;  %87 = vmatpush.msra.mxu0 %v56_v23 }
  0x27   :  { %178 = vmatpush.msra.mxu3 %v102_v30  ;;  %131 = vmatpush.msra.mxu1 %v102_v30 }
  0x28   :  { %164 = vmatpush.msra.mxu2 %v55_v25  ;;  %88 = vmatpush.msra.mxu0 %v55_v25 }
  0x29   :  { %179 = vmatpush.msra.mxu3 %v101_v31  ;;  %132 = vmatpush.msra.mxu1 %v101_v31 }
  0x2a   :  { %165 = vmatpush.msra.mxu2 %v54_v27  ;;  %89 = vmatpush.msra.mxu0 %v54_v27 }
  0x2b   :  { %93 = vmatmul.f32.vlgmr.msra.gmra.mxu2 %v53_v28  ;;  %90 = vmatmul.f32.vlgmr.msra.gmra.mxu0 %v52_v29 }
  0x2c   :  { %180 = vmatpush.msra.mxu3 %v100_v32  ;;  %133 = vmatpush.msra.mxu1 %v100_v32 }
  0x2e   :  { %181 = vmatpush.msra.mxu3 %v99_v33  ;;  %134 = vmatpush.msra.mxu1 %v99_v33 }
  0xa8   :  { %v91_v35 = vpop.f32.mrf.mxu0 }
  0xa9   :  { %v92_v36 = vadd.f32 %v186_v34, %v91_v35 }
  0xab   :  { %v97_v37 = vmax.f32 %v92_v36, 0.0 }
  0xad   :  { %135 = vmatmul.f32.vlgmr.msra.gmra.mxu1 %v97_v37 }
  0xae   :  { %v94_v38 = vpop.f32.mrf.mxu2 }
  0xaf   :  { %v95_v39 = vadd.f32 %v186_v34, %v94_v38 }
  0xb1   :  { %v98_v40 = vmax.f32 %v95_v39, 0.0 }
  0xb3   :  { %138 = vmatmul.f32.vlgmr.msra.gmra.mxu3 %v98_v40 }
 0x12a   :  { %v136_v42 = vpop.f32.mrf.mxu1 }
 0x12b   :  { %v137_v43 = vadd.f32 %v187_v41, %v136_v42 }
 0x12d   :  { %142 = vst [vmem:[%s303_s5] sm:$0xff] %v137_v43 }
 0x136   :  { %v139_v44 = vpop.f32.mrf.mxu3 }
 0x137   :  { %v140_v45 = vadd.f32 %v187_v41, %v139_v44 }
 0x139   :  { %143 = vst [vmem:[%s303_s5 + $0x8] sm:$0xff] %v140_v45 }
 0x13a   :  { %148 = vsyncpa [#allocation3], 1 }
 0x13b   :  { %149 = vsyncpa [#allocation5], 1 }

</bundles_post_ra>
